<compile_context>
chip_gen: v6e
topology: v6e:2x2x1
jax: 0.10.0
libtpu: 0.0.40
codegen_flags: <defaults>
</compile_context>

<pallas_src>
import functools

import jax
import jax.numpy as jnp
from jax.experimental import pallas as pl
from jax.experimental.pallas import tpu as pltpu

_LANES = 128  # packed output slab width (one full vreg lane width)


def _router_kernel(expert_capacity, num_experts,
                   x_ref, wt_ref, b_ref, tri_ref, lane_ref,
                   out_ref, carry_ref):
    # x_ref:     (T, H)    token tile, native dtype
    # wt_ref:    (H, 128)  classifier weight, transposed, zero-padded on lanes
    # b_ref:     (1, 128)  bias; padded lanes hold -1e30 so they never win
    # tri_ref:   (T, T)    lower-triangular ones (inclusive prefix-sum operator)
    # lane_ref:  (1, 128)  lane-index iota as f32 (hoisted constant)
    # out_ref:   (T, 128)  packed slab: [0:E) logits | [E:2E) one-hot | [2E] pmax
    # carry_ref: (1, 128)  running within-batch expert counts (at lanes [E:2E))
    @pl.when(pl.program_id(1) == 0)
    def _():
        carry_ref[...] = jnp.zeros_like(carry_ref)

    lane = lane_ref[...]                                               # (1, 128)
    e_f = float(num_experts)
    tile = tri_ref.shape[0]

    # Router logits on the MXU (f32 accumulation); padded lanes come out -1e30.
    logits = jnp.dot(x_ref[...], wt_ref[...],
                     preferred_element_type=jnp.float32) + b_ref[...]  # (T, 128)

    # Softmax pieces in f32.  max(exp(logits - m)) == 1  =>  pmax == 1/denom.
    m = jnp.max(logits, axis=-1, keepdims=True)                        # (T, 1)
    denom = jnp.sum(jnp.exp(logits - m), axis=-1, keepdims=True)       # (T, 1)
    pmax = 1.0 / denom                                                 # exact divide

    # First-index argmax -> one-hot, placed directly at lanes [E, 2E).
    arg = jnp.min(jnp.where(logits == m, lane, float(_LANES)),
                  axis=-1, keepdims=True)                              # (T, 1)
    onehot_sh = (lane == (arg + e_f)).astype(jnp.float32)              # (T, 128)

    # Inclusive within-batch cumulative count of tokens per expert:
    # per-tile triangular matmul + carry from previous tiles of this batch row.
    priority = jnp.dot(tri_ref[...], onehot_sh,
                       preferred_element_type=jnp.float32) + carry_ref[...]
    carry_ref[...] = priority[tile - 1:, :]                            # running totals
    keep = (priority <= float(expert_capacity)).astype(jnp.float32)

    out_ref[...] = (jnp.where(lane < e_f, logits, 0.0)                 # logits  [0:E)
                    + onehot_sh * keep                                 # one-hot [E:2E)
                    + jnp.where(lane == 2.0 * e_f, pmax, 0.0))         # pmax    [2E]


def _pick_seq_tile(seq_len):
    if seq_len <= 256:
        return seq_len
    for t in (256, 128, 64, 32, 16, 8):
        if seq_len % t == 0:
            return t
    return seq_len


def clmoe_moe_router(hidden_states, classifier_w, classifier_b=None, *,
                     expert_capacity, seq_tile=None):
    """Pallas equivalent of CLMoEMOERouter.forward (eval path, jitter = 0).

    Args:
      hidden_states: (B, S, H), any float dtype (fed to MXU natively).
      classifier_w:  (E, H)  -- PyTorch nn.Linear weight layout.
      classifier_b:  (E,) or None.
      expert_capacity: int.

    Returns:
      expert_index  (B, S, E) int32  (PyTorch returns int64; int32 on TPU)
      router_probs  (B, S, 1) float32
      router_logits (B, S, E) float32
    """
    B, S, H = hidden_states.shape
    E = classifier_w.shape[0]
    assert 2 * E + 1 <= _LANES, "num_experts too large for the packed output slab"

    T = seq_tile if seq_tile is not None else _pick_seq_tile(S)
    assert S % T == 0 and (T % 8 == 0 or T == S), "bad sequence tile"
    n_seq_tiles = S // T
    N = B * S

    x_dtype = hidden_states.dtype
    # Weight transposed and lane-padded to 128; padded bias lanes get a large
    # negative so padded logits never win the softmax / argmax.
    wt_pad = jnp.zeros((H, _LANES), x_dtype).at[:, :E].set(
        classifier_w.T.astype(x_dtype))
    b_real = (jnp.zeros((E,), jnp.float32) if classifier_b is None
              else classifier_b.astype(jnp.float32))
    b_pad = jnp.full((1, _LANES), -1e30, jnp.float32).at[0, :E].set(b_real)

    tri = jnp.tril(jnp.ones((T, T), jnp.float32))      # inclusive prefix operator
    lanes = jnp.arange(_LANES, dtype=jnp.float32)[None, :]

    itemsize = jnp.dtype(x_dtype).itemsize
    cost = pl.CostEstimate(
        flops=2 * N * H * _LANES + 2 * N * T * _LANES,
        transcendentals=N * _LANES,
        bytes_accessed=(N * H * itemsize + N * _LANES * 4
                        + H * _LANES * itemsize + T * T * 4))

    slab = pl.pallas_call(
        functools.partial(_router_kernel, expert_capacity, E),
        out_shape=jax.ShapeDtypeStruct((B, S, _LANES), jnp.float32),
        grid_spec=pltpu.PrefetchScalarGridSpec(
            num_scalar_prefetch=0,
            grid=(B, n_seq_tiles),
            in_specs=[
                pl.BlockSpec((None, T, H), lambda b, s: (b, s, 0)),   # token tile
                pl.BlockSpec((H, _LANES), lambda b, s: (0, 0)),       # weight (resident)
                pl.BlockSpec((1, _LANES), lambda b, s: (0, 0)),       # bias (resident)
                pl.BlockSpec((T, T), lambda b, s: (0, 0)),            # tri (resident)
                pl.BlockSpec((1, _LANES), lambda b, s: (0, 0)),       # lane iota (resident)
            ],
            out_specs=pl.BlockSpec((None, T, _LANES), lambda b, s: (b, s, 0)),
            scratch_shapes=[pltpu.VMEM((1, _LANES), jnp.float32)],    # carry
        ),
        compiler_params=pltpu.CompilerParams(
            dimension_semantics=("parallel", "arbitrary")),
        cost_estimate=cost,
    )(hidden_states, wt_pad, b_pad, tri, lanes)

    router_logits = slab[:, :, :E]
    expert_index = slab[:, :, E:2 * E].astype(jnp.int32)
    router_probs = slab[:, :, 2 * E:2 * E + 1]
    return expert_index, router_probs, router_logits


def _reference(hidden, w, b, expert_capacity, num_experts):
    ref_logits = jnp.einsum("bsh,eh->bse", hidden, w) + b
    ref_probs = jax.nn.softmax(ref_logits, axis=-1)
    ref_arg = jnp.argmax(ref_probs, axis=-1)
    ref_onehot = jax.nn.one_hot(ref_arg, num_experts, dtype=jnp.int32)
    ref_priority = jnp.cumsum(ref_onehot, axis=-2)
    ref_eidx = (ref_onehot * (ref_priority <= expert_capacity)).astype(jnp.int32)
    ref_pmax = jnp.max(ref_probs, axis=-1, keepdims=True)
    return ref_eidx, ref_pmax, ref_logits


if __name__ == "__main__":
    hidden_size = 32
    num_experts = 4
    expert_capacity = 2

    key = jax.random.PRNGKey(0)
    kx, kw, kb = jax.random.split(key, 3)
    w = jax.random.normal(kw, (num_experts, hidden_size),
                          dtype=jnp.float32) / jnp.sqrt(float(hidden_size))
    b = jax.random.normal(kb, (num_experts,), dtype=jnp.float32) * 0.01

    # Case 1: whole sequence in one tile (batch=2, seq=8).
    hidden = jax.random.normal(kx, (2, 8, hidden_size), dtype=jnp.float32)
    eidx, pmax, logits = clmoe_moe_router(hidden, w, b,
                                          expert_capacity=expert_capacity)
    jax.block_until_ready((eidx, pmax, logits))
    r_eidx, r_pmax, r_logits = _reference(hidden, w, b, expert_capacity, num_experts)
    assert jnp.allclose(logits, r_logits, atol=1e-5, rtol=1e-5), "logits mismatch"
    assert jnp.allclose(pmax, r_pmax, atol=1e-5, rtol=1e-5), "router_probs mismatch"
    assert jnp.array_equal(eidx, r_eidx), "expert_index mismatch"

    # Case 2: multiple sequence tiles -> exercises the carry cumsum across tiles.
    hidden2 = jax.random.normal(jax.random.PRNGKey(1), (2, 32, hidden_size),
                                dtype=jnp.float32)
    eidx2, pmax2, logits2 = clmoe_moe_router(hidden2, w, b,
                                             expert_capacity=expert_capacity,
                                             seq_tile=8)
    jax.block_until_ready((eidx2, pmax2, logits2))
    r_eidx2, r_pmax2, r_logits2 = _reference(hidden2, w, b, expert_capacity,
                                             num_experts)
    assert jnp.allclose(logits2, r_logits2, atol=1e-5, rtol=1e-5), "logits mismatch (tiled)"
    assert jnp.allclose(pmax2, r_pmax2, atol=1e-5, rtol=1e-5), "router_probs mismatch (tiled)"
    assert jnp.array_equal(eidx2, r_eidx2), "expert_index mismatch (tiled)"

    print("KERNEL_OK")
</pallas_src>

<mosaic_0001>
module attributes {stable_mosaic.version = 11 : i64} {
  func.func @_router_kernel(%arg0: i32, %arg1: i32, %arg2: memref<1x8x32xf32, #tpu.memory_space<vmem>>, %arg3: memref<32x128xf32, #tpu.memory_space<vmem>>, %arg4: memref<1x128xf32, #tpu.memory_space<vmem>>, %arg5: memref<8x8xf32, #tpu.memory_space<vmem>>, %arg6: memref<1x128xf32, #tpu.memory_space<vmem>>, %arg7: memref<1x8x128xf32, #tpu.memory_space<vmem>>, %arg8: memref<1x128xf32, #tpu.memory_space<vmem>>) attributes {dimension_semantics = [#tpu.dimension_semantics<parallel>, #tpu.dimension_semantics<arbitrary>], iteration_bounds = array<i64: 2, 1>, scalar_prefetch = 0 : i64, scratch_operands = 1 : i64, tpu.core_type = #tpu.core_type<tc>, window_params = [{transform_indices = @transform_0, window_bounds = array<i64: 1, 8, 32>}, {pipeline_mode = #tpu.pipeline_mode<synchronous>, transform_indices = @transform_1, window_bounds = array<i64: 32, 128>}, {pipeline_mode = #tpu.pipeline_mode<synchronous>, transform_indices = @transform_2, window_bounds = array<i64: 1, 128>}, {pipeline_mode = #tpu.pipeline_mode<synchronous>, transform_indices = @transform_3, window_bounds = array<i64: 8, 8>}, {pipeline_mode = #tpu.pipeline_mode<synchronous>, transform_indices = @transform_4, window_bounds = array<i64: 1, 128>}, {transform_indices = @transform_5, window_bounds = array<i64: 1, 8, 128>}]} {
    %c0_i32 = arith.constant 0 : i32
    %0 = arith.cmpi eq, %arg1, %c0_i32 : i32
    %1 = arith.extui %0 : i1 to i32
    %c0_i32_0 = arith.constant 0 : i32
    %2 = arith.cmpi ne, %1, %c0_i32_0 : i32
    scf.if %2 {
      %cst_30 = arith.constant 0.000000e+00 : f32
      %66 = vector.broadcast %cst_30 : f32 to vector<1x128xf32>
      %c0_31 = arith.constant 0 : index
      %c0_32 = arith.constant 0 : index
      %67 = vector.load %arg8[%c0_31, %c0_32] : memref<1x128xf32, #tpu.memory_space<vmem>>, vector<1x128xf32>
      tpu.vector_store %arg8[%c0_31, %c0_32], %66 {strides = array<i32>} : memref<1x128xf32, #tpu.memory_space<vmem>>, vector<1x128xf32>,
    } else {
    }
    %c0 = arith.constant 0 : index
    %c0_1 = arith.constant 0 : index
    %3 = vector.load %arg6[%c0, %c0_1] : memref<1x128xf32, #tpu.memory_space<vmem>>, vector<1x128xf32>
    %c0_2 = arith.constant 0 : index
    %c0_3 = arith.constant 0 : index
    %c0_4 = arith.constant 0 : index
    %4 = vector.load %arg2[%c0_2, %c0_3, %c0_4] : memref<1x8x32xf32, #tpu.memory_space<vmem>>, vector<1x8x32xf32>
    %5 = vector.shape_cast %4 : vector<1x8x32xf32> to vector<8x32xf32>
    %c0_5 = arith.constant 0 : index
    %c0_6 = arith.constant 0 : index
    %6 = vector.load %arg3[%c0_5, %c0_6] : memref<32x128xf32, #tpu.memory_space<vmem>>, vector<32x128xf32>
    %cst = arith.constant dense<0.000000e+00> : vector<8x128xf32>
    %7 = tpu.matmul %5, %6, %cst {dimension_numbers = #tpu.dot_dimension_numbers<[1], [0], [0], [1], [0, 0, 1, 1], [], []>} : vector<8x32xf32>, vector<32x128xf32>, vector<8x128xf32> -> vector<8x128xf32>
    %c0_7 = arith.constant 0 : index
    %c0_8 = arith.constant 0 : index
    %8 = vector.load %arg4[%c0_7, %c0_8] : memref<1x128xf32, #tpu.memory_space<vmem>>, vector<1x128xf32>
    %9 = vector.broadcast %8 : vector<1x128xf32> to vector<8x128xf32>
    %10 = arith.addf %7, %9 : vector<8x128xf32>
    %cst_9 = arith.constant dense<0xFF800000> : vector<8xf32>
    %11 = vector.multi_reduction <maximumf>, %10, %cst_9 [1] : vector<8x128xf32> to vector<8xf32>
    %12 = vector.shape_cast %11 : vector<8xf32> to vector<8x1xf32>
    %13 = vector.broadcast %12 : vector<8x1xf32> to vector<8x128xf32>
    %14 = arith.subf %10, %13 : vector<8x128xf32>
    %15 = math.exp %14 : vector<8x128xf32>
    %cst_10 = arith.constant dense<0.000000e+00> : vector<8xf32>
    %16 = vector.multi_reduction <add>, %15, %cst_10 [1] : vector<8x128xf32> to vector<8xf32>
    %17 = vector.shape_cast %16 : vector<8xf32> to vector<8x1xf32>
    %cst_11 = arith.constant 1.000000e+00 : f32
    %18 = vector.broadcast %cst_11 : f32 to vector<8x1xf32>
    %19 = arith.divf %18, %17 : vector<8x1xf32>
    %20 = vector.broadcast %12 : vector<8x1xf32> to vector<8x128xf32>
    %21 = arith.cmpf oeq, %10, %20 : vector<8x128xf32>
    %cst_12 = arith.constant 1.280000e+02 : f32
    %22 = vector.shape_cast %3 : vector<1x128xf32> to vector<1x128xf32>
    %23 = vector.broadcast %22 : vector<1x128xf32> to vector<8x128xf32>
    %24 = vector.broadcast %cst_12 : f32 to vector<8x128xf32>
    %25 = arith.select %21, %23, %24 : vector<8x128xi1>, vector<8x128xf32>
    %cst_13 = arith.constant dense<0x7F800000> : vector<8xf32>
    %26 = vector.multi_reduction <minimumf>, %25, %cst_13 [1] : vector<8x128xf32> to vector<8xf32>
    %27 = vector.shape_cast %26 : vector<8xf32> to vector<8x1xf32>
    %cst_14 = arith.constant 4.000000e+00 : f32
    %28 = vector.broadcast %cst_14 : f32 to vector<8x1xf32>
    %29 = arith.addf %27, %28 : vector<8x1xf32>
    %30 = vector.broadcast %3 : vector<1x128xf32> to vector<8x128xf32>
    %31 = vector.broadcast %29 : vector<8x1xf32> to vector<8x128xf32>
    %32 = arith.cmpf oeq, %30, %31 : vector<8x128xf32>
    %33 = arith.extui %32 : vector<8x128xi1> to vector<8x128xi32>
    %34 = arith.sitofp %33 : vector<8x128xi32> to vector<8x128xf32>
    %c0_15 = arith.constant 0 : index
    %c0_16 = arith.constant 0 : index
    %35 = vector.load %arg5[%c0_15, %c0_16] : memref<8x8xf32, #tpu.memory_space<vmem>>, vector<8x8xf32>
    %cst_17 = arith.constant dense<0.000000e+00> : vector<8x128xf32>
    %36 = tpu.matmul %35, %34, %cst_17 {dimension_numbers = #tpu.dot_dimension_numbers<[1], [0], [0], [1], [0, 0, 1, 1], [], []>} : vector<8x8xf32>, vector<8x128xf32>, vector<8x128xf32> -> vector<8x128xf32>
    %c0_18 = arith.constant 0 : index
    %c0_19 = arith.constant 0 : index
    %37 = vector.load %arg8[%c0_18, %c0_19] : memref<1x128xf32, #tpu.memory_space<vmem>>, vector<1x128xf32>
    %38 = vector.broadcast %37 : vector<1x128xf32> to vector<8x128xf32>
    %39 = arith.addf %36, %38 : vector<8x128xf32>
    %40 = vector.extract_strided_slice %39 {offsets = [7, 0], sizes = [1, 128], strides = [1, 1]} : vector<8x128xf32> to vector<1x128xf32>
    %c0_20 = arith.constant 0 : index
    %c0_21 = arith.constant 0 : index
    %41 = vector.load %arg8[%c0_20, %c0_21] : memref<1x128xf32, #tpu.memory_space<vmem>>, vector<1x128xf32>
    tpu.vector_store %arg8[%c0_20, %c0_21], %40 {strides = array<i32>} : memref<1x128xf32, #tpu.memory_space<vmem>>, vector<1x128xf32>,
    %cst_22 = arith.constant 2.000000e+00 : f32
    %42 = vector.broadcast %cst_22 : f32 to vector<8x128xf32>
    %43 = arith.cmpf ole, %39, %42 : vector<8x128xf32>
    %44 = arith.extui %43 : vector<8x128xi1> to vector<8x128xi32>
    %45 = arith.sitofp %44 : vector<8x128xi32> to vector<8x128xf32>
    %cst_23 = arith.constant 4.000000e+00 : f32
    %46 = vector.broadcast %cst_23 : f32 to vector<1x128xf32>
    %47 = arith.cmpf olt, %3, %46 : vector<1x128xf32>
    %cst_24 = arith.constant 0.000000e+00 : f32
    %48 = vector.shape_cast %47 : vector<1x128xi1> to vector<1x128xi1>
    %49 = vector.broadcast %48 : vector<1x128xi1> to vector<8x128xi1>
    %50 = vector.broadcast %cst_24 : f32 to vector<8x128xf32>
    %51 = arith.select %49, %10, %50 : vector<8x128xi1>, vector<8x128xf32>
    %52 = arith.mulf %34, %45 : vector<8x128xf32>
    %53 = arith.addf %51, %52 : vector<8x128xf32>
    %cst_25 = arith.constant 8.000000e+00 : f32
    %54 = vector.broadcast %cst_25 : f32 to vector<1x128xf32>
    %55 = arith.cmpf oeq, %3, %54 : vector<1x128xf32>
    %cst_26 = arith.constant 0.000000e+00 : f32
    %56 = vector.shape_cast %55 : vector<1x128xi1> to vector<1x128xi1>
    %57 = vector.broadcast %56 : vector<1x128xi1> to vector<8x128xi1>
    %58 = vector.shape_cast %19 : vector<8x1xf32> to vector<8x1xf32>
    %59 = vector.broadcast %58 : vector<8x1xf32> to vector<8x128xf32>
    %60 = vector.broadcast %cst_26 : f32 to vector<8x128xf32>
    %61 = arith.select %57, %59, %60 : vector<8x128xi1>, vector<8x128xf32>
    %62 = arith.addf %53, %61 : vector<8x128xf32>
    %c0_27 = arith.constant 0 : index
    %c0_28 = arith.constant 0 : index
    %c0_29 = arith.constant 0 : index
    %63 = vector.load %arg7[%c0_27, %c0_28, %c0_29] : memref<1x8x128xf32, #tpu.memory_space<vmem>>, vector<1x8x128xf32>
    %64 = vector.shape_cast %63 : vector<1x8x128xf32> to vector<8x128xf32>
    %65 = vector.shape_cast %62 : vector<8x128xf32> to vector<1x8x128xf32>
    tpu.vector_store %arg7[%c0_27, %c0_28, %c0_29], %65 {strides = array<i32>} : memref<1x8x128xf32, #tpu.memory_space<vmem>>, vector<1x8x128xf32>,
    return
  }
  func.func @transform_0(%arg0: i32, %arg1: i32) -> (i32, i32, i32) {
    %c0_i32 = arith.constant 0 : i32
    %c0_i32_0 = arith.constant 0 : i32
    return %arg0, %arg1, %c0_i32 : i32, i32, i32
  }
  func.func @transform_1(%arg0: i32, %arg1: i32) -> (i32, i32) {
    %c0_i32 = arith.constant 0 : i32
    %c0_i32_0 = arith.constant 0 : i32
    %c0_i32_1 = arith.constant 0 : i32
    return %c0_i32, %c0_i32_0 : i32, i32
  }
  func.func @transform_2(%arg0: i32, %arg1: i32) -> (i32, i32) {
    %c0_i32 = arith.constant 0 : i32
    %c0_i32_0 = arith.constant 0 : i32
    %c0_i32_1 = arith.constant 0 : i32
    return %c0_i32, %c0_i32_0 : i32, i32
  }
  func.func @transform_3(%arg0: i32, %arg1: i32) -> (i32, i32) {
    %c0_i32 = arith.constant 0 : i32
    %c0_i32_0 = arith.constant 0 : i32
    %c0_i32_1 = arith.constant 0 : i32
    return %c0_i32, %c0_i32_0 : i32, i32
  }
  func.func @transform_4(%arg0: i32, %arg1: i32) -> (i32, i32) {
    %c0_i32 = arith.constant 0 : i32
    %c0_i32_0 = arith.constant 0 : i32
    %c0_i32_1 = arith.constant 0 : i32
    return %c0_i32, %c0_i32_0 : i32, i32
  }
  func.func @transform_5(%arg0: i32, %arg1: i32) -> (i32, i32, i32) {
    %c0_i32 = arith.constant 0 : i32
    %c0_i32_0 = arith.constant 0 : i32
    return %arg0, %arg1, %c0_i32 : i32, i32, i32
  }
}

</mosaic_0001>

<bundles_post_ra>
// kernel: tpu_custom_call.1
= control target key start
LH: loop header
LB: loop body
LE: loop exit
PB: predicated region body
PF: predicated region fallthrough
CT: control target
= control target key end

     0   :  { %s1161_s0 = inlined_call_operand.hbm [shape: f32[2,8,32], index: 0, kind: input, shape index: {}]   ;;  %s1162_s1 = inlined_call_operand.hbm [shape: f32[32,128], index: 1, kind: input, shape index: {}]   ;;  %s1163_s2 = inlined_call_operand.vmem [shape: f32[1,128], index: 2, kind: input, shape index: {}]   ;;  %s1164_s3 = inlined_call_operand.hbm [shape: f32[8,8], index: 3, kind: input, shape index: {}]   ;;  %s1165_s4 = inlined_call_operand.vmem [shape: f32[1,128], index: 4, kind: input, shape index: {}]   ;;  %s1166_s5 = inlined_call_operand.hbm [shape: f32[2,8,128], index: 5, kind: output, shape index: {}]  }
   0x1   :  { %1170 = sst [smem:[#allocation13_spill]] %s1162_s1 }
   0x2   :  { %10 = vsyncpa [#allocation4], 0 }
   0x3   :  { %12 = vsyncpa [#allocation4 + $0x1], 0 }
   0x4   :  { %13 = vsyncpa [#allocation7], 0 }
   0x5   :  { %14 = vsyncpa [#allocation5], 0 }
   0x6   :  { %16 = vsyncpa [#allocation5 + $0x1], 0  ;;  %s965_s18 = smov 0   ;;  %s967_s19 = smov 0  }
   0x7   :  { %s969_s20 = smov 0   ;;  %s971_s21 = smov 0  }
   0x8   :  { %s973_s22 = smov 0   ;;  %s975_s23 = smov 0  }
   0x9 LB: > { %s619_s24 = sadd.s32 4294967295, %s923_s23   ;;  %s620_s25 = sadd.s32 4294967294, %s923_s23   ;;  %s923_s23 = sphi %s975_s23, %s22_s23   ;;  %s919_s22 = sphi %s973_s22, %s1188_s22   ;;  %s915_s21 = sphi %s971_s21, %s1187_s21   ;;  %s911_s20 = sphi %s969_s20, %s1186_s20   ;;  %s907_s19 = sphi %s967_s19, %s1185_s19   ;;  %s903_s18 = sphi %s965_s18, %s1184_s18  }
   0xa   : > { %p56_p0 = scmp.ne.s32.totalorder %s907_s19, %s903_s18  ;;  %p999_p1 = scmp.eq.s32.totalorder %s619_s24, 0 }
   0xb   : > { %p1003_p2 = scmp.eq.s32.totalorder %s619_s24, 1  ;;  %p172_p3 = scmp.eq.s32.totalorder %s620_s25, 1 }
   0xc   : > { %s1171_s26 = scalar_select %p999_p1, 1, 0 }
   0xd   : > { %p1009_p4 = por %p999_p1, %p56_p0  ;;  %p621_p5 = scmp.ge.s32.totalorder %s923_s23, 1 }
   0xe   : > { %p1014_p6 = por %p172_p3, %p56_p0  ;;  %p179_p7 = scmp.lt.s32.totalorder %s923_s23, 3 }
   0xf   : > { %s1173_s28 = scalar_select %p1009_p4, 1, 0 }
  0x10   : > { %s1174_s29 = scalar_select %p1014_p6, 1, 0 }
  0x11   : > { %p1019_p8 = pnand %p621_p5, %p179_p7  ;;  %s925_s6 = smov [#allocation6]  }
  0x12   : > { %s191_s7 = sshll.u32 %s925_s6, 4  ;;  %s926_s9 = smov [#allocation8]   ;;  %s192_s7 = int_to_ptr.vmem [resolvable:$true] %s191_s7 }
  0x13   : > { %p678_p9 = pneg %p1019_p8  ;;  %s208_s10 = sshll.u32 %s926_s9, 4  ;;  %s209_s10 = int_to_ptr.vmem [resolvable:$true] %s208_s10 }
  0x14   : > { %s770_s11 = scalar_lea.vmem %s192_s7, 512  ;;  %p778_p5 = scmp.lt.s32.totalorder %s192_s7, %s192_s7 }
  0x15   : > { %p1028_p11 = pnand %p678_p9, %p999_p1  ;;  %p771_p13 = scmp.ne.s32.totalorder %s192_s7, %s770_s11 }
  0x16   : > { %p779_p7 = scmp.lt.s32.totalorder %s770_s11, %s770_s11 }
  0x17   : > { %p761_p12 = pneg %p1028_p11 }
  0x18   : > { %p780_p10 = por %p779_p7, %p778_p5 }
  0x19   : > { %p773_p0 = pnand %p771_p13, %p761_p12 }
  0x1b   : > { %p774_p3 = pneg %p773_p0 }
  0x1d   : > { %p781_p9 = pnand %p780_p10, %p774_p3 }
  0x1f   : > { %784 = shalt.err (!%p781_p9)
}
  0x20   : > { %s927_s12 = smov 128   ;;  %s928_s13 = smov 8  }
  0x21   : > { %s1177_s1 = sld [smem:[#allocation13_spill]]  ;;  %s796_s16 = scalar_lea.vmem %s209_s10, 128 }
  0x22   : > { %p797_p6 = scmp.ne.s32.totalorder %s209_s10, %s796_s16  ;;  %p804_p1 = scmp.lt.s32.totalorder %s209_s10, %s209_s10 }
  0x23   : > { %p805_p4 = scmp.lt.s32.totalorder %s796_s16, %s796_s16 }
  0x24   : > { %p799_p13 = pnand %p797_p6, %p761_p12 }
  0x25   : > { %p806_p5 = por %p805_p4, %p804_p1 }
  0x26   : > { %p800_p0 = pneg %p799_p13 }
  0x27   : > { %681 = dma.hbm_to_vmem [thread:$0]  (!%p1028_p11), %s1177_s1, 512, %s192_s7, [#allocation7], %s927_s12, %s927_s12, %s928_s13  }
  0x28   : > { %p807_p10 = pnand %p806_p5, %p800_p0 }
  0x2a   : > { %810 = shalt.err (!%p807_p10)
}
  0x2b   : > { %684 = dma.hbm_to_vmem [thread:$0]  (!%p1028_p11), %s1164_s3, 128, %s209_s10, [#allocation7]  }
  0x2c   : > { %s34_s25 = sadd.s32 1, %s919_s22  ;;  %s43_s6 = sadd.s32 1, %s911_s20 }
  0x2d   : > { %p36_p1 = scmp.ge.s32.totalorder %s34_s25, 2  ;;  %p50_p4 = scmp.ne.s32.totalorder %s911_s20, %s907_s19 }
  0x2e   : > { %p51_p6 = scmp.eq.s32.totalorder %s923_s23, 0  ;;  %p695_p12 = scmp.lt.s32.totalorder %s923_s23, 2 }
  0x2f   : > { %s1190_s25 = smov (%p36_p1, %s34_s25), 0  ;;  %p1060_p7 = por %p1003_p2, %p50_p4 }
  0x30   : > { %p52_p3 = por %p51_p6, %p50_p4  ;;  %s38_s8 = ssub.s32 %s919_s22, %s1190_s25 }
  0x31   : > { %s222_s9 = sand.u32 1, %s911_s20   ;;  %p41_p9 = scmp.eq.s32.totalorder %s38_s8, 0 }
  0x32   : > { %s625_s10 = sshll.u32 %s222_s9, 3  ;;  %s626_s11 = sshll.u32 %s919_s22, 7 }
  0x33   : > { %s1069_s12 = scalar_select %p41_p9, %s911_s20, %s43_s6  }
  0x34   : > { %s232_s15 = scalar_lea.hbm %s1161_s0, %s626_s11  ;;  %s226_s16 = scalar_lea.vmem [#allocation3], %s625_s10 }
  0x35   : > { %s234_s17 = sshll.u32 %s226_s16, 4  ;;  %p1076_p11 = pnand %p695_p12, %p52_p3  ;;  %s235_s17 = int_to_ptr.vmem [resolvable:$true] %s234_s17 }
  0x36   : > { %s223_s24 = scalar_lea.sflag [#allocation4], %s222_s9  ;;  %s824_s8 = scalar_lea.vmem %s235_s17, 128 }
  0x37   : > { %p813_p2 = pneg %p1076_p11  ;;  %p825_p13 = scmp.ne.s32.totalorder %s235_s17, %s824_s8 }
  0x38   : > { %s929_s6 = smov [#allocation3]  }
  0x39   : > { %p827_p0 = pnand %p825_p13, %p813_p2  ;;  %s829_s1 = sshll.u32 %s929_s6, 4  ;;  %s830_s1 = int_to_ptr.vmem [resolvable:$false] %s829_s1 }
  0x3a   : > { %s831_s11 = scalar_lea.vmem %s830_s1, 256  ;;  %p832_p10 = scmp.lt.s32.totalorder %s235_s17, %s830_s1 }
  0x3b   : > { %p828_p5 = pneg %p827_p0  ;;  %p833_p1 = scmp.lt.s32.totalorder %s831_s11, %s824_s8 }
  0x3d   : > { %p834_p4 = por %p833_p1, %p832_p10 }
  0x3f   : > { %p835_p6 = pnand %p834_p4, %p828_p5 }
  0x41   : > { %838 = shalt.err (!%p835_p6)
}
  0x42   : > { %688 = dma.hbm_to_vmem [thread:$0]  (!%p1076_p11), %s232_s15, 128, %s235_s17, %s223_s24  }
  0x43   : > { %243 = sbr.rel (%p1019_p8) target bundleno = 779 (0x30b), region = 40  ;;  %s1087_s9 = sand.u32 (!%p1019_p8), 1, %s907_s19  }
  0x44   : > { %s628_s10 = sshll.u32 (!%p1019_p8), %s1087_s9, 3  ;;  %s246_s13 = scalar_lea.sflag (!%p1019_p8), [#allocation4], %s1087_s9 }
  0x45   : > { %s249_s1 = scalar_lea.vmem (!%p1019_p8), [#allocation3], %s628_s10  ;;  %p1180_p12 = scmp.ne.s32.totalorder (!%p1019_p8), %s1173_s28, 0 }
  0x48   : > { %890 = dma.done.wait (%p1180_p12), %s246_s13, 128  }
  0x49   : > { %892 = vsyncadd (%p1180_p12), %s246_s13, 4294967168  ;;  %p1181_p3 = scmp.ne.s32.totalorder %s1171_s26, 0 }
  0x4b   : > { %894 = dma.done.wait (%p1181_p3), [#allocation7], 640  }
  0x4c   : > { %896 = vsyncadd (%p1181_p3), [#allocation7], 4294966656  ;;  %v930_v0 = vmov 0.0   ;;  %vm931_vm0 = vmmov 0   ;;  %v294_v1 = vld [vmem:[#allocation6 + $0x18] sm:$0xff]  ;;  %v293_v2 = vld [vmem:[#allocation6 + $0x10] sm:$0xff]  ;;  %v387_v10 = vlaneseq }
  0x4d   : > { %650 = vmatprep.subr.mxu0 %v930_v0  ;;  %288 = vst [vmem:[#allocation2] sm:$0x1] %v930_v0  ;;  %658 = vmatprep.mubr.msk.f32.mxu0 %vm931_vm0, %v930_v0  ;;  %v292_v3 = vld [vmem:[#allocation6 + $0x8] sm:$0xff]  ;;  %v291_v4 = vld [vmem:[#allocation6] sm:$0xff]  ;;  %v290_v5 = vld [vmem:[%s249_s1] sm:$0xff]  ;;  %vm302_vm1 = vcmask 261120  }
  0x4e   : > { %661 = vmatprep.subr.mxu1 %v930_v0  ;;  %663 = vmatprep.mubr.msk.f32.mxu1 %vm931_vm0, %v930_v0  ;;  %v632_v6 = vld [vmem:[%s1163_s2] ss:$0 sm:$0xff]  ;;  %v388_v11 = vshrl.u32 %v387_v10, 7  ;;  %v399_v22 = vld [vmem:[#allocation8] sm:$0xff]  ;;  %vm407_vm3 = vcmask 64512   ;;  %v932_v23 = vmov 1.0  }
  0x4f   : > { %651 = vmatpush3.msra.mxu0 %v294_v1  ;;  %v289_v13 = vld [vmem:[%s1165_s4] sm:$0x1]  ;;  %v933_v25 = vmov 0   ;;  %s640_s15 = sshll.u32 %s915_s21, 7  ;;  %s283_s16 = scalar_lea.vmem [#allocation9], %s628_s10 }
  0x50   : > { %652 = vmatprep.subr.mxu0 %v930_v0  ;;  %v389_v12 = vsub.s32 0, %v388_v11  ;;  %vm485_vm5 = vcmp.lt.f32.partialorder %v289_v13, 4.0  ;;  %vm495_vm6 = vcmp.eq.f32.partialorder %v289_v13, 8.0  ;;  %s520_s17 = sshll.u32 %s283_s16, 4  ;;  %s518_s8 = scalar_lea.hbm %s1166_s5, %s640_s15  ;;  %s521_s17 = int_to_ptr.vmem [resolvable:$true] %s520_s17 }
  0x51   : > { %653 = vmatpush3.msra.mxu0 %v293_v2  ;;  %v486_v26 = vsel %vm485_vm5, 1, %v933_v25  ;;  %v496_v27 = vsel %vm495_vm6, 1, %v933_v25  ;;  %s506_s6 = scalar_lea.sflag [#allocation5], %s1087_s9  ;;  %s839_s11 = scalar_lea.vmem %s521_s17, 128 }
  0x52   : > { %654 = vmatprep.subr.mxu0 %v930_v0  ;;  %v390_v14 = vrot.slane %v289_v13, %v389_v12  ;;  %v490_v29 = vrot.slane %v486_v26, %v389_v12  ;;  %v500_v31 = vrot.slane %v496_v27, %v389_v12  ;;  %p840_p8 = scmp.ne.s32.totalorder %s521_s17, %s839_s11  ;;  %s934_s13 = smov [#allocation9]  }
  0x53   : > { %655 = vmatpush3.msra.mxu0 %v292_v3  ;;  %s843_s21 = sshll.u32 %s934_s13, 4  ;;  %s844_s21 = int_to_ptr.vmem [resolvable:$false] %s843_s21 }
  0x54   : > { %656 = vmatprep.subr.mxu0 %v930_v0  ;;  %v635_v28 = vld [vmem:[#allocation2] ss:$0 sm:$0xff]  ;;  %vm491_vm8 = vcmp.eq.s32.totalorder %v490_v29, 1  ;;  %vm501_vm9 = vcmp.eq.s32.totalorder %v500_v31, 1  ;;  %p841_p9 = pnand %p840_p8, %p1060_p7  ;;  %s845_s10 = scalar_lea.vmem %s844_s21, 256 }
  0x55   : > { %657 = vmatpush3.msra.mxu0 %v291_v4  ;;  %p846_p2 = scmp.lt.s32.totalorder %s521_s17, %s844_s21  ;;  %p847_p13 = scmp.lt.s32.totalorder %s845_s10, %s839_s11 }
  0x56   : > { %659 = vmatmul.mubr.msk.f32.vlgmr.msra.gmra.mxu0 %vm302_vm1, %v290_v5  ;;  %p842_p11 = pneg %p841_p9 }
  0x57   : > { %p848_p0 = por %p847_p13, %p846_p2 }
  0x59   : > { %p849_p5 = pnand %p848_p0, %p842_p11 }
 0x116   : > { %v372_v7 = vpop.f32.mrf.mxu0 }
 0x117   : > { %v373_v8 = vadd.f32 %v632_v6, %v372_v7 }
 0x118   : > { %v660_v9 = vpop.f32.mrf.mxu0 }
 0x119   : > { %376 = vmax.xlane.f32.xlu0 %v373_v8  ;;  %v492_v38 = vsel %vm491_vm8, %v373_v8, 0.0 }
 0x1a2   : > { %v377_v15 = vpop.xlane.xlu0 %376 }
 0x1a3   : > { %v378_v16 = vsub.f32 %v373_v8, %v377_v15  ;;  %vm385_vm2 = vcmp.eq.f32.partialorder %v373_v8, %v377_v15 }
 0x1a4   : > { %v392_v17 = vsel %vm385_vm2, %v390_v14, 128.0 }
 0x1a5   : > { %v379_v18 = vmul.f32 1.442695, %v378_v16  ;;  %393 = vmin.xlane.f32.xlu0 %v392_v17 }
 0x1a7   : > { %755 = vpow2.f32 %v379_v18 }
 0x1b4   : > { %v756_v19 = vpop.eup %755 }
 0x1b5   : > { %381 = vadd.xlane.f32.xlu1 %v756_v19 }
 0x22e   : > { %v394_v20 = vpop.xlane.xlu0 %393 }
 0x22f   : > { %v395_v21 = vadd.f32 4.0, %v394_v20 }
 0x231   : > { %vm396_vm4 = vcmp.eq.f32.partialorder %v390_v14, %v395_v21 }
 0x232   : > { %662 = vmatpush3.msk.msra.mxu1 %vm396_vm4, %v932_v23  ;;  %v634_v34 = vsel %vm396_vm4, 1.0, %v930_v0 }
 0x233   : > { %664 = vmatmul.mubr.msk.f32.vlgmr.msra.gmra.mxu1 %vm407_vm3, %v399_v22 }
 0x23e   : > { %v382_v24 = vpop.xlane.xlu1 %381 }
 0x23f   : > { %757 = vrcp.f32 %v382_v24 }
 0x24c   : > { %v758_v36 = vpop.eup %757 }
 0x24d   : > { %v502_v40 = vsel %vm501_vm9, %v758_v36, 0.0 }
 0x2f3   : > { %v477_v30 = vpop.f32.mrf.mxu1 }
 0x2f4   : > { %v478_v32 = vadd.f32 %v635_v28, %v477_v30 }
 0x2f5   : > { %v665_v33 = vpop.f32.mrf.mxu1 }
 0x2f6   : > { %481 = vst [vmem:[#allocation2 - $0x7] sm:$0x80] %v478_v32  ;;  %vm482_vm7 = vcmp.le.f32.partialorder %v478_v32, 2.0 }
 0x2f7   : > { %v638_v35 = vsel %vm482_vm7, 1.0, %v930_v0 }
 0x2f8   : > { %v493_v37 = vmul.f32 %v638_v35, %v634_v34 }
 0x2fa   : > { %v494_v39 = vadd.f32 %v493_v37, %v492_v38 }
 0x2fc   : > { %v503_v41 = vadd.f32 %v502_v40, %v494_v39 }
 0x2fe   : > { %504 = vst [vmem:[%s283_s16] sm:$0xff] %v503_v41 }
 0x2ff   : > { %852 = shalt.err (!%p849_p5)
}
 0x300   : > { %s853_s1 = scalar_lea.hbm %s518_s8, 128  ;;  %s857_s28 = scalar_lea.hbm %s1166_s5, 256 }
 0x301   : > { %p854_p10 = scmp.ne.s32.totalorder %s518_s8, %s853_s1  ;;  %p858_p6 = scmp.lt.s32.totalorder %s518_s8, %s1166_s5 }
 0x302   : > { %p859_p12 = scmp.lt.s32.totalorder %s857_s28, %s853_s1 }
 0x303   : > { %p855_p1 = pnand %p854_p10, %p1060_p7 }
 0x304   : > { %p860_p3 = por %p859_p12, %p858_p6 }
 0x305   : > { %p856_p4 = pneg %p855_p1 }
 0x307   : > { %p861_p8 = pnand %p860_p3, %p856_p4 }
 0x309   : > { %864 = shalt.err (!%p861_p8)
}
 0x30a   : > { %676 = dma.vmem_to_hbm [thread:$0]  (%p1060_p7), %s521_s17, 128, %s518_s8, %s506_s6  }
 0x30b PF: > { %s532_s15 = sand.u32 1, %s903_s18   ;;  %p1182_p9 = scmp.ne.s32.totalorder %s1174_s29, 0 }
 0x30c   : > { %p1183_p11 = scmp.ge.s32.totalorder %s923_s23, 2  ;;  %s533_s16 = scalar_lea.sflag [#allocation5], %s532_s15 }
 0x30e   : > { %p690_p2 = pnand %p1183_p11, %p1182_p9 }
 0x310   : > { %p691_p13 = pneg %p690_p2 }
 0x312   : > { %898 = dma.done.wait (%p691_p13), %s533_s16, 128  }
 0x313   : > { %900 = vsyncadd (%p691_p13), %s533_s16, 4294967168  ;;  %s22_s23 = sadd.s32 1, %s923_s23   ;;  %s1184_s18 = smov %s907_s19 }
 0x314   : > { %p19_p0 = scmp.ge.s32.totalorder %s22_s23, 4   ;;  %s1185_s19 = smov %s911_s20 }
 0x315   : > { %s1186_s20 = smov %s1069_s12  ;;  %s1187_s21 = smov %s919_s22 }
 0x316   : > { %s1188_s22 = smov %s1190_s25  ;;  %21 = sbr.rel (!%p19_p0) target bundleno = 9 (0x9), region = 97 }
 0x31b   :  { %538 = vsyncpa [#allocation4], 1 }
 0x31c   :  { %540 = vsyncpa [#allocation4 + $0x1], 1 }
 0x31d   :  { %541 = vsyncpa [#allocation7], 1 }
 0x31e   :  { %542 = vsyncpa [#allocation5], 1 }
 0x31f   :  { %544 = vsyncpa [#allocation5 + $0x1], 1 }

</bundles_post_ra>
